<compile_context>
chip_gen: v5e
topology: v5e:2x2
jax: 0.10.0
libtpu: 0.0.40
codegen_flags: <defaults>
</compile_context>

<pallas_src>
import math

import jax
import jax.numpy as jnp
from jax.experimental import pallas as pl
from jax.experimental.pallas import tpu as pltpu


def _attn_pool_kernel(x_ref, w_ref, out_ref):
    # x_ref:  (TB, N, H) VMEM block of node features for TB batch rows
    # w_ref:  (1, H)     attention projection weight (row layout)
    # out_ref:(TB, H)    pooled output for these TB batch rows
    x = x_ref[...].astype(jnp.float32)                  # (TB, N, H)
    w = w_ref[...].astype(jnp.float32)                  # (1, H) -> broadcasts

    # attention logits per node: Linear(hidden -> 1), bias dropped (inert
    # under softmax).  VPU multiply + lane reduce, no MXU.
    s = jnp.sum(x * w, axis=-1, keepdims=True)          # (TB, N, 1)

    # numerically stable softmax over the node axis (sublane reduce)
    m = jnp.max(s, axis=1, keepdims=True)               # (TB, 1, 1)
    e = jnp.exp(s - m)                                  # (TB, N, 1)
    denom = jnp.sum(e, axis=1, keepdims=True)           # (TB, 1, 1)
    p = e * pl.reciprocal(denom, approx=False)          # (TB, N, 1)

    # attention-weighted readout: sum_n p[b, n] * x[b, n]  ->  (TB, H)
    pooled = jnp.sum(p * x, axis=1)                     # (TB, H)
    out_ref[...] = pooled.astype(out_ref.dtype)


def attention_pooling(t, w):
    """t: [B, N, H] node features; w: [H, 1] (or [H]) attention weight.

    Returns the attention-pooled graph embeddings, shape [B, H].
    """
    B, N, H = t.shape
    w_row = jnp.reshape(w, (1, H)).astype(t.dtype)      # (1, H) row layout

    # Batch TB rows per grid step (TB divides B; up to 8 for sublane density).
    TB = math.gcd(B, 8)
    grid = (B // TB,)

    return pl.pallas_call(
        _attn_pool_kernel,
        out_shape=jax.ShapeDtypeStruct((B, H), t.dtype),
        grid_spec=pltpu.PrefetchScalarGridSpec(
            num_scalar_prefetch=0,
            grid=grid,
            in_specs=[
                pl.BlockSpec((TB, N, H), lambda i: (i, 0, 0)),
                pl.BlockSpec((1, H), lambda i: (0, 0)),
            ],
            out_specs=pl.BlockSpec((TB, H), lambda i: (i, 0)),
        ),
        compiler_params=pltpu.CompilerParams(
            dimension_semantics=("parallel",)
        ),
    )(t, w_row)


def attention_pooling_ref(t, w):
    """Pure-JAX reference for correctness checking."""
    s = jnp.einsum("bnh,h->bn", t, jnp.reshape(w, (-1,)))   # (B, N)
    p = jax.nn.softmax(s, axis=1)                            # (B, N)
    return jnp.einsum("bn,bnh->bh", p, t)                    # (B, H)


if __name__ == "__main__":
    # TODO(synk): PyTorch reference forward is `pass` (returns None) and
    # nn.Linear() has no dims; implemented the intended attention pooling.
    key = jax.random.PRNGKey(0)
    k_t, k_w = jax.random.split(key, 2)

    B, N, H = 2, 8, 32          # batch, nodes-per-graph, hidden
    t = jax.random.normal(k_t, (B, N, H), dtype=jnp.float32)
    # deterministic "Linear(H, 1)" weight (bias is inert under softmax)
    w = jax.random.normal(k_w, (H, 1), dtype=jnp.float32) * 0.1

    out = attention_pooling(t, w)
    out = jax.block_until_ready(out)

    ref = attention_pooling_ref(t, w)
    assert out.shape == (B, H)
    assert jnp.allclose(out, ref, atol=1e-5, rtol=1e-5)

    print("KERNEL_OK")
</pallas_src>

<mosaic_0001>
module attributes {stable_mosaic.version = 11 : i64} {
  func.func @_attn_pool_kernel(%arg0: i32, %arg1: memref<2x8x32xf32, #tpu.memory_space<vmem>>, %arg2: memref<1x32xf32, #tpu.memory_space<vmem>>, %arg3: memref<2x32xf32, #tpu.memory_space<vmem>>) attributes {dimension_semantics = [#tpu.dimension_semantics<parallel>], iteration_bounds = array<i64: 1>, scalar_prefetch = 0 : i64, scratch_operands = 0 : i64, tpu.core_type = #tpu.core_type<tc>, window_params = [{transform_indices = @transform_0, window_bounds = array<i64: 2, 8, 32>}, {pipeline_mode = #tpu.pipeline_mode<synchronous>, transform_indices = @transform_1, window_bounds = array<i64: 1, 32>}, {transform_indices = @transform_2, window_bounds = array<i64: 2, 32>}]} {
    %c0 = arith.constant 0 : index
    %c0_0 = arith.constant 0 : index
    %c0_1 = arith.constant 0 : index
    %0 = vector.load %arg1[%c0, %c0_0, %c0_1] : memref<2x8x32xf32, #tpu.memory_space<vmem>>, vector<2x8x32xf32>
    %c0_2 = arith.constant 0 : index
    %c0_3 = arith.constant 0 : index
    %1 = vector.load %arg2[%c0_2, %c0_3] : memref<1x32xf32, #tpu.memory_space<vmem>>, vector<1x32xf32>
    %2 = vector.shape_cast %1 : vector<1x32xf32> to vector<1x1x32xf32>
    %3 = vector.broadcast %2 : vector<1x1x32xf32> to vector<2x8x32xf32>
    %4 = arith.mulf %0, %3 : vector<2x8x32xf32>
    %cst = arith.constant dense<0.000000e+00> : vector<2x8xf32>
    %5 = vector.multi_reduction <add>, %4, %cst [2] : vector<2x8x32xf32> to vector<2x8xf32>
    %6 = vector.shape_cast %5 : vector<2x8xf32> to vector<2x8x1xf32>
    %cst_4 = arith.constant dense<0xFF800000> : vector<2x1xf32>
    %7 = vector.multi_reduction <maximumf>, %6, %cst_4 [1] : vector<2x8x1xf32> to vector<2x1xf32>
    %8 = vector.shape_cast %7 : vector<2x1xf32> to vector<2x1x1xf32>
    %9 = vector.broadcast %8 : vector<2x1x1xf32> to vector<2x8x1xf32>
    %10 = arith.subf %6, %9 : vector<2x8x1xf32>
    %11 = math.exp %10 : vector<2x8x1xf32>
    %cst_5 = arith.constant dense<0.000000e+00> : vector<2x1xf32>
    %12 = vector.multi_reduction <add>, %11, %cst_5 [1] : vector<2x8x1xf32> to vector<2x1xf32>
    %13 = vector.shape_cast %12 : vector<2x1xf32> to vector<2x1x1xf32>
    %14 = tpu.reciprocal %13 : vector<2x1x1xf32> -> vector<2x1x1xf32>
    %15 = vector.broadcast %14 : vector<2x1x1xf32> to vector<2x8x1xf32>
    %16 = arith.mulf %11, %15 : vector<2x8x1xf32>
    %17 = vector.broadcast %16 : vector<2x8x1xf32> to vector<2x8x32xf32>
    %18 = arith.mulf %17, %0 : vector<2x8x32xf32>
    %cst_6 = arith.constant dense<0.000000e+00> : vector<2x32xf32>
    %19 = vector.multi_reduction <add>, %18, %cst_6 [1] : vector<2x8x32xf32> to vector<2x32xf32>
    %c0_7 = arith.constant 0 : index
    %c0_8 = arith.constant 0 : index
    %20 = vector.load %arg3[%c0_7, %c0_8] : memref<2x32xf32, #tpu.memory_space<vmem>>, vector<2x32xf32>
    tpu.vector_store %arg3[%c0_7, %c0_8], %19 {strides = array<i32>} : memref<2x32xf32, #tpu.memory_space<vmem>>, vector<2x32xf32>,
    return
  }
  func.func @transform_0(%arg0: i32) -> (i32, i32, i32) {
    %c0_i32 = arith.constant 0 : i32
    %c0_i32_0 = arith.constant 0 : i32
    %c0_i32_1 = arith.constant 0 : i32
    return %arg0, %c0_i32, %c0_i32_0 : i32, i32, i32
  }
  func.func @transform_1(%arg0: i32) -> (i32, i32) {
    %c0_i32 = arith.constant 0 : i32
    %c0_i32_0 = arith.constant 0 : i32
    %c0_i32_1 = arith.constant 0 : i32
    return %c0_i32, %c0_i32_0 : i32, i32
  }
  func.func @transform_2(%arg0: i32) -> (i32, i32) {
    %c0_i32 = arith.constant 0 : i32
    %c0_i32_0 = arith.constant 0 : i32
    return %arg0, %c0_i32 : i32, i32
  }
}

</mosaic_0001>

<bundles_post_ra>
// kernel: tpu_custom_call.1
= control target key start
LH: loop header
LB: loop body
LE: loop exit
PB: predicated region body
PF: predicated region fallthrough
CT: control target
= control target key end

     0   :  { %7 = vsyncpa [#allocation3], 0  ;;  %s291_s0 = inlined_call_operand.hbm [shape: f32[2,8,32], index: 0, kind: input, shape index: {}]   ;;  %s292_s1 = inlined_call_operand.hbm [shape: f32[1,32], index: 1, kind: input, shape index: {}]   ;;  %s293_s2 = inlined_call_operand.hbm [shape: f32[2,32], index: 2, kind: output, shape index: {}]  }
   0x1   :  { %8 = vsyncpa [#allocation6], 0 }
   0x2   :  { %9 = vsyncpa [#allocation4], 0  ;;  %s14_s11 = sshll.u32 %s291_s0, 4  ;;  %s250_s12 = smov [#allocation2]   ;;  %s15_s11 = int_to_ptr.hbm [resolvable:$true] %s14_s11 }
   0x3   :  { %s16_s13 = sshll.u32 %s250_s12, 4  ;;  %s28_s16 = sshll.u32 %s292_s1, 4  ;;  %s17_s13 = int_to_ptr.vmem [resolvable:$true] %s16_s13  ;;  %s29_s16 = int_to_ptr.hbm [resolvable:$true] %s28_s16 }
   0x4   :  { %s251_s17 = smov 128   ;;  %s252_s18 = smov 8  }
   0x5   :  { %22 = dma.hbm_to_vmem [thread:$0]  %s15_s11, 256, %s17_s13, [#allocation3], %s251_s17, %s251_s17, %s252_s18  }
   0x6   :  { %s253_s19 = smov [#allocation5]  }
   0x7   :  { %s30_s20 = sshll.u32 %s253_s19, 4  ;;  %s31_s20 = int_to_ptr.vmem [resolvable:$true] %s30_s20 }
   0x8   :  { %33 = dma.hbm_to_vmem [thread:$0]  %s29_s16, 16, %s31_s20, [#allocation6]  }
   0x9   :  { %244 = dma.done.wait [#allocation3], 256  }
   0xa   :  { %245 = vsyncadd [#allocation3], 4294967040 }
   0xb   :  { %246 = dma.done.wait [#allocation6], 16  }
   0xc   :  { %247 = vsyncadd [#allocation6], 4294967280  ;;  %v276_v0 = vld [vmem:[#allocation2] sm:$0xff]  ;;  %v163_v1 = vld [vmem:[#allocation5] ss:$0 sm:$0xff]  ;;  %vm50_vm0 = vcmask 261120  }
   0xd   :  { %v48_v2 = vmul.f32 %v163_v1, %v276_v0  ;;  %v279_v3 = vld [vmem:[#allocation2 + $0x8] sm:$0xff]  ;;  %s254_s0 = smov [#allocation7]   ;;  %s147_s23 = sshll.u32 %s293_s2, 4  ;;  %vm135_vm9 = vcmask 1041409   ;;  %vm138_vm10 = vcmask 254976   ;;  %s148_s23 = int_to_ptr.hbm [resolvable:$true] %s147_s23 }
   0xe   :  { %v49_v5 = vmul.f32 %v163_v1, %v279_v3  ;;  %s145_s1 = sshll.u32 %s254_s0, 4  ;;  %s146_s1 = int_to_ptr.vmem [resolvable:$true] %s145_s1 }
   0xf   :  { %v51_v4 = vsel %vm50_vm0, %v48_v2, 0.0 }
  0x10   :  { %52 = vadd.xlane.f32.xlu0 %v51_v4  ;;  %v54_v6 = vsel %vm50_vm0, %v49_v5, 0.0 }
  0x18   :  { %55 = vadd.xlane.f32.xlu0 %v54_v6 }
  0x83   :  { %v53_v7 = vpop.xlane.xlu0 %52 }
  0x84   :  { %v57_v8 = vrot.slane %v53_v7, 4 }
  0x86   :  { %v58_v9 = vmax.f32 %v53_v7, %v57_v8 }
  0x88   :  { %v59_v10 = vrot.slane %v58_v9, 2 }
  0x8a   :  { %v60_v11 = vmax.f32 %v58_v9, %v59_v10 }
  0x8b   :  { %v56_v12 = vpop.xlane.xlu0 %55 }
  0x8c   :  { %v61_v13 = vrot.slane %v60_v11, 1  ;;  %v63_v14 = vrot.slane %v56_v12, 4 }
  0x8e   :  { %v62_v15 = vmax.f32 %v60_v11, %v61_v13  ;;  %v64_v16 = vmax.f32 %v56_v12, %v63_v14 }
  0x90   :  { %v69_v17 = vsub.f32 %v53_v7, %v62_v15  ;;  %v65_v18 = vrot.slane %v64_v16, 2 }
  0x92   :  { %v71_v19 = vmul.f32 1.442695, %v69_v17  ;;  %v66_v20 = vmax.f32 %v64_v16, %v65_v18 }
  0x94   :  { %164 = vpow2.f32 %v71_v19  ;;  %v67_v21 = vrot.slane %v66_v20, 1 }
  0x96   :  { %v68_v22 = vmax.f32 %v66_v20, %v67_v21 }
  0x98   :  { %v70_v23 = vsub.f32 %v56_v12, %v68_v22 }
  0x9a   :  { %v165_v24 = vpop.eup %164  ;;  %v73_v25 = vmul.f32 1.442695, %v70_v23 }
  0x9b   :  { %v75_v26 = vrot.slane %v165_v24, 4 }
  0x9c   :  { %166 = vpow2.f32 %v73_v25 }
  0x9d   :  { %v76_v27 = vadd.f32 %v165_v24, %v75_v26 }
  0x9f   :  { %v77_v28 = vrot.slane %v76_v27, 2 }
  0xa1   :  { %v78_v29 = vadd.f32 %v77_v28, %v76_v27 }
  0xa2   :  { %v167_v30 = vpop.eup %166 }
  0xa3   :  { %v79_v31 = vrot.slane %v78_v29, 1  ;;  %v81_v32 = vrot.slane %v167_v30, 4 }
  0xa5   :  { %v80_v33 = vadd.f32 %v79_v31, %v78_v29  ;;  %v82_v34 = vadd.f32 %v167_v30, %v81_v32 }
  0xa7   :  { %168 = vrcp.f32 %v80_v33  ;;  %v83_v35 = vrot.slane %v82_v34, 2  ;;  %v98_v42 = vand.u32 2147483648, %v80_v33  ;;  %v96_v44 = vand.u32 2147483647, %v80_v33 }
  0xa8   :  { %vm92_vm2 = vweird.f32 %v80_v33 }
  0xa9   :  { %v84_v36 = vadd.f32 %v83_v35, %v82_v34  ;;  %v99_v47 = vor.u32 1.1754944e-38, %v98_v42  ;;  %vm97_vm4 = vcmp.eq.f32.partialorder %v96_v44, 8.507059e+37 }
  0xab   :  { %v85_v37 = vrot.slane %v84_v36, 1 }
  0xad   :  { %v169_v38 = vpop.eup %168  ;;  %v86_v39 = vadd.f32 %v85_v37, %v84_v36 }
  0xae   :  { %v88_v40 = vmul.f32 %v169_v38, %v80_v33  ;;  %vm93_vm1 = vweird.f32 %v169_v38 }
  0xaf   :  { %170 = vrcp.f32 %v86_v39  ;;  %vm94_vm3 = vmor %vm92_vm2, %vm93_vm1  ;;  %v112_v53 = vand.u32 2147483648, %v86_v39  ;;  %v110_v55 = vand.u32 2147483647, %v86_v39  ;;  %vm106_vm6 = vweird.f32 %v86_v39 }
  0xb0   :  { %v89_v41 = vsub.f32 1.0, %v88_v40 }
  0xb1   :  { %v113_v59 = vor.u32 1.1754944e-38, %v112_v53  ;;  %vm111_vm8 = vcmp.eq.f32.partialorder %v110_v55, 8.507059e+37 }
  0xb2   :  { %v90_v43 = vmul.f32 %v169_v38, %v89_v41 }
  0xb4   :  { %v91_v45 = vadd.f32 %v169_v38, %v90_v43 }
  0xb5   :  { %v171_v46 = vpop.eup %170 }
  0xb6   :  { %v102_v48 = vmul.f32 %v171_v46, %v86_v39  ;;  %v95_v49 = vsel %vm94_vm3, %v169_v38, %v91_v45  ;;  %vm107_vm5 = vweird.f32 %v171_v46 }
  0xb7   :  { %v100_v50 = vsel %vm97_vm4, %v99_v47, %v95_v49  ;;  %vm108_vm7 = vmor %vm106_vm6, %vm107_vm5 }
  0xb8   :  { %v103_v51 = vsub.f32 1.0, %v102_v48  ;;  %v115_v52 = vmul.f32 %v165_v24, %v100_v50 }
  0xba   :  { %v104_v54 = vmul.f32 %v171_v46, %v103_v51  ;;  %v117_v56 = vmul.f32 %v115_v52, %v276_v0 }
  0xbc   :  { %v105_v57 = vadd.f32 %v171_v46, %v104_v54  ;;  %v119_v58 = vsel %vm50_vm0, %v117_v56, 0.0 }
  0xbd   :  { %v120_v60 = vrot.slane %v119_v58, 4 }
  0xbe   :  { %v109_v61 = vsel %vm108_vm7, %v171_v46, %v105_v57 }
  0xbf   :  { %v114_v62 = vsel %vm111_vm8, %v113_v59, %v109_v61  ;;  %v121_v63 = vadd.f32 %v120_v60, %v119_v58 }
  0xc0   :  { %v116_v1 = vmul.f32 %v167_v30, %v114_v62 }
  0xc1   :  { %v122_v4 = vrot.slane %v121_v63, 2 }
  0xc2   :  { %v118_v2 = vmul.f32 %v116_v1, %v279_v3 }
  0xc3   :  { %v123_v7 = vadd.f32 %v122_v4, %v121_v63 }
  0xc4   :  { %v126_v5 = vsel %vm50_vm0, %v118_v2, 0.0 }
  0xc5   :  { %v127_v6 = vrot.slane %v126_v5, 4  ;;  %v124_v9 = vrot.slane %v123_v7, 1 }
  0xc7   :  { %v128_v0 = vadd.f32 %v127_v6, %v126_v5  ;;  %v125_v12 = vadd.f32 %v124_v9, %v123_v7 }
  0xc9   :  { %v129_v8 = vrot.slane %v128_v0, 2 }
  0xcb   :  { %v130_v10 = vadd.f32 %v129_v8, %v128_v0 }
  0xcd   :  { %v131_v11 = vrot.slane %v130_v10, 1 }
  0xcf   :  { %v132_v13 = vadd.f32 %v131_v11, %v130_v10 }
  0xd1   :  { %v136_v3 = vsel %vm135_vm9, %v132_v13, %v125_v12 }
  0xd2   :  { %139 = vst.msk [vmem:[#allocation7] sm:$0x3] %vm138_vm10, %v136_v3 }
  0xd3   :  { %150 = dma.vmem_to_hbm [thread:$0]  %s146_s1, 32, %s148_s23, [#allocation4]  }
  0xd4   :  { %248 = dma.done.wait [#allocation4], 32  }
  0xd5   :  { %249 = vsyncadd [#allocation4], 4294967264 }
  0xd6   :  { %155 = vsyncpa [#allocation3], 1 }
  0xd7   :  { %156 = vsyncpa [#allocation6], 1 }
  0xd8   :  { %157 = vsyncpa [#allocation4], 1 }

</bundles_post_ra>
